<compile_context>
chip_gen: v5e
topology: v5e:2x2
jax: 0.10.0
libtpu: 0.0.40
codegen_flags: <defaults>
</compile_context>

<pallas_src>
import jax
import jax.numpy as jnp
from jax.experimental import pallas as pl
from jax.experimental.pallas import tpu as pltpu

_LANES = 128
_NCORES = 2   # leading "parallel" grid axis; shards across TensorCores on v7x


def _ceil_to(a, m):
    return -(-a // m) * m


def _make_mse_kernel(n_elems, block_rows, tiles_per_core):
    """Accumulate sum((x-y)^2) into an (8,128) per-lane partial accumulator."""
    block_elems = block_rows * _LANES

    def kernel(x_ref, y_ref, out_ref, acc_ref):
        c = pl.program_id(0)   # core-split axis ("parallel")
        i = pl.program_id(1)   # reduction axis ("arbitrary")

        @pl.when(i == 0)
        def _init():
            acc_ref[...] = jnp.zeros_like(acc_ref)

        # Global flat-element offset of this grid step.  NOTE: intentionally NOT
        # clamped (the input index_map is); clamped duplicate blocks on the
        # core-split axis have start >= n_elems and are fully masked below.
        start = (c * tiles_per_core + i) * block_elems

        def sq_diff():
            return (x_ref[...].astype(jnp.float32)
                    - y_ref[...].astype(jnp.float32))

        def accumulate(d):
            # (block_rows,128) -> (block_rows//8, 8, 128) is an exact vreg-tile
            # split (layout-preserving); the axis-0 reduce is pure VPU adds.
            acc_ref[...] += jnp.sum((d * d).reshape(-1, 8, _LANES), axis=0)

        @pl.when(start + block_elems <= n_elems)      # fully in-bounds: fast path
        def _full():
            accumulate(sq_diff())

        @pl.when(start + block_elems > n_elems)       # tail / duplicate: mask it
        def _tail():
            row = jax.lax.broadcasted_iota(jnp.int32, (block_rows, _LANES), 0)
            col = jax.lax.broadcasted_iota(jnp.int32, (block_rows, _LANES), 1)
            gidx = start + row * _LANES + col
            accumulate(jnp.where(gidx < n_elems, sq_diff(), 0.0))

        @pl.when(i == tiles_per_core - 1)
        def _finalize():
            out_ref[...] = acc_ref[...]               # per-core (8,128) partials

    return kernel


def mse_loss_pallas(pred, target, *, block_rows=2048):
    """nn.MSELoss(reduction='mean') equivalent computed with a Pallas TPU kernel."""
    assert pred.shape == target.shape, (pred.shape, target.shape)
    n = int(pred.size)
    if n == 0:
        return jnp.float32(0.0)

    # Keep the native dtype across HBM->VMEM (halves traffic for bf16/f16); the
    # upcast to f32 happens inside the kernel.  Unsupported dtypes fall back to f32.
    if pred.dtype != target.dtype:
        dt = jnp.promote_types(pred.dtype, target.dtype)
        pred, target = pred.astype(dt), target.astype(dt)
    itemsize = jnp.dtype(pred.dtype).itemsize
    if itemsize not in (2, 4):
        pred, target = pred.astype(jnp.float32), target.astype(jnp.float32)
        itemsize = 4
    sublanes = 8 if itemsize == 4 else 16   # vreg sublane packing granularity

    x = pred.reshape(-1)
    y = target.reshape(-1)

    # Lane-dense (rows, 128) view.  A pad (full copy) only happens when n is not
    # already a multiple of 128, or for tiny inputs; padded elements are masked
    # inside the kernel so their values never contribute.
    n_pad = _ceil_to(n, _LANES)
    rows = n_pad // _LANES
    if rows < sublanes:                      # tiny input: round up to one vreg row-group
        n_pad = sublanes * _LANES
        rows = sublanes
    if n_pad != n:
        x = jnp.pad(x, (0, n_pad - n))
        y = jnp.pad(y, (0, n_pad - n))
    x = x.reshape(rows, _LANES)
    y = y.reshape(rows, _LANES)

    # ~1 MiB f32 blocks by default; clamp to the array and to the sublane granule.
    br = max(sublanes, (min(block_rows, rows) // sublanes) * sublanes)
    n_blocks = -(-rows // br)
    tiles_per_core = -(-n_blocks // _NCORES)
    grid = (_NCORES, tiles_per_core)

    def in_index_map(c, i):
        # Clamp so the DMA never starts past the array; clamped duplicate blocks
        # are fully masked inside the kernel (their element range is >= n).
        return (jnp.minimum(c * tiles_per_core + i, n_blocks - 1), 0)

    kernel = _make_mse_kernel(n, br, tiles_per_core)

    partials = pl.pallas_call(
        kernel,
        out_shape=jax.ShapeDtypeStruct((_NCORES * 8, _LANES), jnp.float32),
        grid_spec=pltpu.PrefetchScalarGridSpec(
            num_scalar_prefetch=0,
            grid=grid,
            in_specs=[
                pl.BlockSpec((br, _LANES), in_index_map),
                pl.BlockSpec((br, _LANES), in_index_map),
            ],
            out_specs=pl.BlockSpec((8, _LANES), lambda c, i: (c, 0)),
            scratch_shapes=[pltpu.VMEM((8, _LANES), jnp.float32)],
        ),
        compiler_params=pltpu.CompilerParams(
            dimension_semantics=("parallel", "arbitrary"),
        ),
        cost_estimate=pl.CostEstimate(
            flops=3 * n, transcendentals=0, bytes_accessed=2 * n * itemsize,
        ),
    )(x, y)

    # Single tiny fused reduce; 1/n is a compile-time constant folded into it.
    return jnp.sum(partials) * (1.0 / n)


class TrainingLossPallas:
    """JAX/Pallas port of the PyTorch TrainingLoss module."""

    def __init__(self, counting_loss, contrast_loss=None, wcl=1e-05):
        self.counting_loss = counting_loss
        self.contrast_loss = contrast_loss
        self.wcl = wcl

    def __call__(self, outputs, density_map, pt_map):
        dest, corr_map = outputs['density_map'], outputs['corr_map']
        counting_loss = self.counting_loss(dest, density_map)
        if self.contrast_loss:
            contrast_loss = self.contrast_loss(corr_map, pt_map, density_map) * self.wcl
            return (counting_loss, contrast_loss)
        else:
            # TODO(synk): contrast_loss is an injected callable with no definition in the
            # reference module; only the contrast_loss=None path is exercised here.
            return (counting_loss, 0)


if __name__ == "__main__":
    key = jax.random.PRNGKey(0)
    k1, k2, k3, k4, k5, k6 = jax.random.split(key, 6)

    B, C, H, W = 2, 1, 16, 16          # density maps (NCHW, C=1)
    dest = jax.random.normal(k1, (B, C, H, W), dtype=jnp.float32)
    density_map = jax.random.normal(k2, (B, C, H, W), dtype=jnp.float32)
    corr_map = jax.random.normal(k3, (B, 8, H, W), dtype=jnp.float32)   # unused (contrast_loss=None)
    pt_map = (jax.random.uniform(k4, (B, C, H, W)) > 0.95).astype(jnp.float32)

    loss_fn = TrainingLossPallas(counting_loss=mse_loss_pallas, contrast_loss=None, wcl=1e-05)
    outputs = {'density_map': dest, 'corr_map': corr_map}

    counting_loss, contrast_loss = loss_fn(outputs, density_map, pt_map)
    counting_loss = jax.block_until_ready(counting_loss)

    # sanity check against pure-JAX reference (nn.MSELoss mean reduction)
    ref = jnp.mean((dest - density_map) ** 2)
    assert jnp.allclose(counting_loss, ref, rtol=1e-5, atol=1e-6), (counting_loss, ref)
    assert contrast_loss == 0

    # extra check: exercise the partial-tail-block + clamped-duplicate-block paths
    a = jax.random.normal(k5, (2, 1, 8, 160), dtype=jnp.float32)   # 2560 elems -> 20 rows
    b = jax.random.normal(k6, (2, 1, 8, 160), dtype=jnp.float32)
    got = jax.block_until_ready(mse_loss_pallas(a, b, block_rows=8))
    ref2 = jnp.mean((a - b) ** 2)
    assert jnp.allclose(got, ref2, rtol=1e-5, atol=1e-6), (got, ref2)

    print("KERNEL_OK")
</pallas_src>

<mosaic_0001>
module attributes {stable_mosaic.version = 11 : i64} {
  func.func @kernel(%arg0: i32, %arg1: i32, %arg2: memref<8x128xf32, #tpu.memory_space<vmem>>, %arg3: memref<8x128xf32, #tpu.memory_space<vmem>>, %arg4: memref<8x128xf32, #tpu.memory_space<vmem>>, %arg5: memref<8x128xf32, #tpu.memory_space<vmem>>) attributes {dimension_semantics = [#tpu.dimension_semantics<parallel>, #tpu.dimension_semantics<arbitrary>], iteration_bounds = array<i64: 2, 1>, scalar_prefetch = 0 : i64, scratch_operands = 1 : i64, tpu.core_type = #tpu.core_type<tc>, window_params = [{transform_indices = @transform_0, window_bounds = array<i64: 8, 128>}, {transform_indices = @transform_1, window_bounds = array<i64: 8, 128>}, {transform_indices = @transform_2, window_bounds = array<i64: 8, 128>}]} {
    %c0_i32 = arith.constant 0 : i32
    %0 = arith.cmpi eq, %arg1, %c0_i32 : i32
    %1 = arith.extui %0 : i1 to i32
    %c0_i32_0 = arith.constant 0 : i32
    %2 = arith.cmpi ne, %1, %c0_i32_0 : i32
    scf.if %2 {
      %cst = arith.constant 0.000000e+00 : f32
      %17 = vector.broadcast %cst : f32 to vector<8x128xf32>
      %c0 = arith.constant 0 : index
      %c0_8 = arith.constant 0 : index
      %18 = vector.load %arg5[%c0, %c0_8] : memref<8x128xf32, #tpu.memory_space<vmem>>, vector<8x128xf32>
      tpu.vector_store %arg5[%c0, %c0_8], %17 {strides = array<i32>} : memref<8x128xf32, #tpu.memory_space<vmem>>, vector<8x128xf32>,
    } else {
    }
    %c1_i32 = arith.constant 1 : i32
    %3 = arith.muli %arg0, %c1_i32 : i32
    %4 = arith.addi %3, %arg1 : i32
    %c1024_i32 = arith.constant 1024 : i32
    %5 = arith.muli %4, %c1024_i32 : i32
    %c1024_i32_1 = arith.constant 1024 : i32
    %6 = arith.addi %5, %c1024_i32_1 : i32
    %c512_i32 = arith.constant 512 : i32
    %7 = arith.cmpi sle, %6, %c512_i32 : i32
    %8 = arith.extui %7 : i1 to i32
    %c0_i32_2 = arith.constant 0 : i32
    %9 = arith.cmpi ne, %8, %c0_i32_2 : i32
    scf.if %9 {
      %c0 = arith.constant 0 : index
      %c0_8 = arith.constant 0 : index
      %17 = vector.load %arg2[%c0, %c0_8] : memref<8x128xf32, #tpu.memory_space<vmem>>, vector<8x128xf32>
      %c0_9 = arith.constant 0 : index
      %c0_10 = arith.constant 0 : index
      %18 = vector.load %arg3[%c0_9, %c0_10] : memref<8x128xf32, #tpu.memory_space<vmem>>, vector<8x128xf32>
      %19 = arith.subf %17, %18 : vector<8x128xf32>
      %c0_11 = arith.constant 0 : index
      %c0_12 = arith.constant 0 : index
      %20 = vector.load %arg5[%c0_11, %c0_12] : memref<8x128xf32, #tpu.memory_space<vmem>>, vector<8x128xf32>
      %21 = arith.mulf %19, %19 : vector<8x128xf32>
      %22 = vector.shape_cast %21 : vector<8x128xf32> to vector<1x8x128xf32>
      %cst = arith.constant dense<0.000000e+00> : vector<8x128xf32>
      %23 = vector.multi_reduction <add>, %22, %cst [0] : vector<1x8x128xf32> to vector<8x128xf32>
      %24 = arith.addf %20, %23 : vector<8x128xf32>
      %c0_13 = arith.constant 0 : index
      %c0_14 = arith.constant 0 : index
      %25 = vector.load %arg5[%c0_13, %c0_14] : memref<8x128xf32, #tpu.memory_space<vmem>>, vector<8x128xf32>
      tpu.vector_store %arg5[%c0_13, %c0_14], %24 {strides = array<i32>} : memref<8x128xf32, #tpu.memory_space<vmem>>, vector<8x128xf32>,
    } else {
    }
    %c1024_i32_3 = arith.constant 1024 : i32
    %10 = arith.addi %5, %c1024_i32_3 : i32
    %c512_i32_4 = arith.constant 512 : i32
    %11 = arith.cmpi sgt, %10, %c512_i32_4 : i32
    %12 = arith.extui %11 : i1 to i32
    %c0_i32_5 = arith.constant 0 : i32
    %13 = arith.cmpi ne, %12, %c0_i32_5 : i32
    scf.if %13 {
      %17 = tpu.iota {dimensions = array<i32: 0>} : vector<8x128xi32>
      %18 = tpu.iota {dimensions = array<i32: 1>} : vector<8x128xi32>
      %c128_i32 = arith.constant 128 : i32
      %19 = vector.broadcast %c128_i32 : i32 to vector<8x128xi32>
      %20 = arith.muli %17, %19 : vector<8x128xi32>
      %21 = vector.broadcast %5 : i32 to vector<8x128xi32>
      %22 = arith.addi %21, %20 : vector<8x128xi32>
      %23 = arith.addi %22, %18 : vector<8x128xi32>
      %c512_i32_8 = arith.constant 512 : i32
      %24 = vector.broadcast %c512_i32_8 : i32 to vector<8x128xi32>
      %25 = arith.cmpi slt, %23, %24 : vector<8x128xi32>
      %c0 = arith.constant 0 : index
      %c0_9 = arith.constant 0 : index
      %26 = vector.load %arg2[%c0, %c0_9] : memref<8x128xf32, #tpu.memory_space<vmem>>, vector<8x128xf32>
      %c0_10 = arith.constant 0 : index
      %c0_11 = arith.constant 0 : index
      %27 = vector.load %arg3[%c0_10, %c0_11] : memref<8x128xf32, #tpu.memory_space<vmem>>, vector<8x128xf32>
      %28 = arith.subf %26, %27 : vector<8x128xf32>
      %cst = arith.constant 0.000000e+00 : f32
      %29 = vector.broadcast %cst : f32 to vector<8x128xf32>
      %30 = arith.select %25, %28, %29 : vector<8x128xi1>, vector<8x128xf32>
      %c0_12 = arith.constant 0 : index
      %c0_13 = arith.constant 0 : index
      %31 = vector.load %arg5[%c0_12, %c0_13] : memref<8x128xf32, #tpu.memory_space<vmem>>, vector<8x128xf32>
      %32 = arith.mulf %30, %30 : vector<8x128xf32>
      %33 = vector.shape_cast %32 : vector<8x128xf32> to vector<1x8x128xf32>
      %cst_14 = arith.constant dense<0.000000e+00> : vector<8x128xf32>
      %34 = vector.multi_reduction <add>, %33, %cst_14 [0] : vector<1x8x128xf32> to vector<8x128xf32>
      %35 = arith.addf %31, %34 : vector<8x128xf32>
      %c0_15 = arith.constant 0 : index
      %c0_16 = arith.constant 0 : index
      %36 = vector.load %arg5[%c0_15, %c0_16] : memref<8x128xf32, #tpu.memory_space<vmem>>, vector<8x128xf32>
      tpu.vector_store %arg5[%c0_15, %c0_16], %35 {strides = array<i32>} : memref<8x128xf32, #tpu.memory_space<vmem>>, vector<8x128xf32>,
    } else {
    }
    %c0_i32_6 = arith.constant 0 : i32
    %14 = arith.cmpi eq, %arg1, %c0_i32_6 : i32
    %15 = arith.extui %14 : i1 to i32
    %c0_i32_7 = arith.constant 0 : i32
    %16 = arith.cmpi ne, %15, %c0_i32_7 : i32
    scf.if %16 {
      %c0 = arith.constant 0 : index
      %c0_8 = arith.constant 0 : index
      %17 = vector.load %arg5[%c0, %c0_8] : memref<8x128xf32, #tpu.memory_space<vmem>>, vector<8x128xf32>
      %c0_9 = arith.constant 0 : index
      %c0_10 = arith.constant 0 : index
      %18 = vector.load %arg4[%c0_9, %c0_10] : memref<8x128xf32, #tpu.memory_space<vmem>>, vector<8x128xf32>
      tpu.vector_store %arg4[%c0_9, %c0_10], %17 {strides = array<i32>} : memref<8x128xf32, #tpu.memory_space<vmem>>, vector<8x128xf32>,
    } else {
    }
    return
  }
  func.func @transform_0(%arg0: i32, %arg1: i32) -> (i32, i32) {
    %c1_i32 = arith.constant 1 : i32
    %0 = arith.muli %arg0, %c1_i32 : i32
    %1 = arith.addi %0, %arg1 : i32
    %c0_i32 = arith.constant 0 : i32
    %2 = arith.minsi %1, %c0_i32 : i32
    %c0_i32_0 = arith.constant 0 : i32
    %c0_i32_1 = arith.constant 0 : i32
    return %2, %c0_i32_0 : i32, i32
  }
  func.func @transform_1(%arg0: i32, %arg1: i32) -> (i32, i32) {
    %c1_i32 = arith.constant 1 : i32
    %0 = arith.muli %arg0, %c1_i32 : i32
    %1 = arith.addi %0, %arg1 : i32
    %c0_i32 = arith.constant 0 : i32
    %2 = arith.minsi %1, %c0_i32 : i32
    %c0_i32_0 = arith.constant 0 : i32
    %c0_i32_1 = arith.constant 0 : i32
    return %2, %c0_i32_0 : i32, i32
  }
  func.func @transform_2(%arg0: i32, %arg1: i32) -> (i32, i32) {
    %c0_i32 = arith.constant 0 : i32
    %c0_i32_0 = arith.constant 0 : i32
    return %arg0, %c0_i32 : i32, i32
  }
}

</mosaic_0001>

<bundles_post_ra>
// kernel: tpu_custom_call.1
= control target key start
LH: loop header
LB: loop body
LE: loop exit
PB: predicated region body
PF: predicated region fallthrough
CT: control target
= control target key end

     0   :  { %7 = vsyncpa [#allocation4], 0  ;;  %s882_s0 = inlined_call_operand.hbm [shape: f32[8,128], index: 0, kind: input, shape index: {}]   ;;  %s883_s1 = inlined_call_operand.hbm [shape: f32[8,128], index: 1, kind: input, shape index: {}]   ;;  %s884_s2 = inlined_call_operand.hbm [shape: f32[16,128], index: 2, kind: output, shape index: {}]  }
   0x1   :  { %9 = vsyncpa [#allocation4 + $0x1], 0 }
   0x2   :  { %10 = vsyncpa [#allocation7], 0 }
   0x3   :  { %12 = vsyncpa [#allocation7 + $0x1], 0 }
   0x4   :  { %13 = vsyncpa [#allocation5], 0 }
   0x5   :  { %15 = vsyncpa [#allocation5 + $0x1], 0  ;;  %s698_s9 = smov 0   ;;  %s700_s10 = smov 0  }
   0x6   :  { %s702_s11 = smov 0   ;;  %s704_s12 = smov 0  }
   0x7   :  { %s706_s13 = smov 0   ;;  %s708_s14 = smov 0  }
   0x8   :  { %s710_s15 = smov 0   ;;  %s712_s16 = smov 0  }
   0x9 LB: > { %s400_s17 = sadd.s32 4294967295, %s678_s16   ;;  %s401_s18 = sadd.s32 4294967294, %s678_s16   ;;  %s678_s16 = sphi %s712_s16, %s21_s16   ;;  %s674_s15 = sphi %s710_s15, %s896_s15   ;;  %s670_s14 = sphi %s708_s14, %s895_s14   ;;  %s666_s13 = sphi %s706_s13, %s872_s13   ;;  %s662_s12 = sphi %s704_s12, %s894_s12   ;;  %s658_s11 = sphi %s702_s11, %s893_s11   ;;  %s654_s10 = sphi %s700_s10, %s892_s10   ;;  %s650_s9 = sphi %s698_s9, %s891_s9  }
   0xa   : > { %s33_s19 = sadd.s32 1, %s674_s15  ;;  %p647_p1 = scmp.ne.s32.totalorder %s666_s13, 0 }
   0xb   : > { %p35_p0 = scmp.ge.s32.totalorder %s33_s19, 2  ;;  %p54_p2 = scmp.eq.s32.totalorder %s678_s16, 0 }
   0xc   : > { %p59_p3 = scmp.ne.s32.totalorder %s666_s13, %s662_s12  ;;  %p60_p5 = scmp.eq.s32.totalorder %s400_s17, 0 }
   0xd   : > { %s898_s19 = smov (%p35_p0, %s33_s19), 0  ;;  %p744_p4 = por %p647_p1, %p54_p2 }
   0xe   : > { %p748_p6 = por %p60_p5, %p59_p3  ;;  %s101_s22 = ssub.s32 %s674_s15, %s898_s19 }
   0xf   : > { %p102_p7 = scmp.eq.s32.totalorder %s101_s22, 0  ;;  %s104_s23 = sadd.s32 1, %s658_s11 }
  0x10   : > { %p114_p8 = scmp.ne.s32.totalorder %s658_s11, %s654_s10  ;;  %p115_p9 = scmp.eq.s32.totalorder %s400_s17, 1 }
  0x11   : > { %s756_s24 = scalar_select %p102_p7, %s658_s11, %s104_s23  }
  0x12   : > { %p120_p10 = scmp.ne.s32.totalorder %s654_s10, %s650_s9  ;;  %p121_p11 = scmp.eq.s32.totalorder %s401_s18, 1 }
  0x13   : > { %p762_p12 = por %p115_p9, %p114_p8  ;;  %p403_p13 = scmp.ge.s32.totalorder %s678_s16, 2 }
  0x14   : > { %p767_p0 = por %p121_p11, %p120_p10  ;;  %p436_p1 = scmp.lt.s32.totalorder %s678_s16, 2 }
  0x15   : > { %s154_s29 = sshll.u32 %s882_s0, 4  ;;  %s680_s30 = smov [#allocation3]   ;;  %s155_s29 = int_to_ptr.hbm [resolvable:$true] %s154_s29 }
  0x16   : > { %s156_s3 = sshll.u32 %s680_s30, 4  ;;  %p777_p2 = pnand %p436_p1, %p744_p4  ;;  %s157_s3 = int_to_ptr.vmem [resolvable:$true] %s156_s3 }
  0x17   : > { %p408_p3 = scmp.ge.s32.totalorder %s678_s16, 1  ;;  %p183_p5 = scmp.lt.s32.totalorder %s678_s16, 3 }
  0x18   : > { %s511_s5 = sshra.s32 %s155_s29, 4  ;;  %p515_p8 = pneg %p777_p2  ;;  %s512_s5 = int_to_ptr.hbm [resolvable:$true] %s511_s5 }
  0x19   : > { %s513_s6 = scalar_lea.hbm %s512_s5, 8  ;;  %s518_s12 = scalar_lea.hbm %s882_s0, 8 }
  0x1a   : > { %p514_p7 = scmp.ne.s32.totalorder %s512_s5, %s513_s6  ;;  %p520_p4 = scmp.lt.s32.totalorder %s518_s12, %s513_s6 }
  0x1c   : > { %p516_p9 = pnand %p515_p8, %p514_p7 }
  0x1e   : > { %p517_p10 = pneg %p516_p9 }
  0x20   : > { %p522_p11 = pnand %p520_p4, %p517_p10 }
  0x22   : > { %525 = shalt.err (!%p522_p11)
}
  0x23   : > { %428 = dma.hbm_to_vmem [thread:$0]  (!%p777_p2), %s155_s29, 128, %s157_s3, [#allocation4]  }
  0x24   : > { %p797_p1 = pnand %p408_p3, %p183_p5  ;;  %s176_s22 = sshll.u32 %s883_s1, 4  ;;  %s177_s22 = int_to_ptr.hbm [resolvable:$true] %s176_s22 }
  0x25   : > { %s681_s23 = smov [#allocation6]   ;;  %s541_s28 = sshra.s32 %s177_s22, 4  ;;  %s542_s28 = int_to_ptr.hbm [resolvable:$true] %s541_s28 }
  0x26   : > { %s178_s27 = sshll.u32 %s681_s23, 4  ;;  %s543_s30 = scalar_lea.hbm %s542_s28, 8  ;;  %s179_s27 = int_to_ptr.vmem [resolvable:$true] %s178_s27 }
  0x27   : > { %p544_p7 = scmp.ne.s32.totalorder %s542_s28, %s543_s30  ;;  %s548_s5 = scalar_lea.hbm %s883_s1, 8 }
  0x28   : > { %p550_p3 = scmp.lt.s32.totalorder %s548_s5, %s543_s30 }
  0x29   : > { %p546_p9 = pnand %p544_p7, %p515_p8 }
  0x2b   : > { %p547_p10 = pneg %p546_p9 }
  0x2d   : > { %p552_p5 = pnand %p550_p3, %p547_p10 }
  0x2f   : > { %555 = shalt.err (!%p552_p5)
}
  0x30   : > { %431 = dma.hbm_to_vmem [thread:$0]  (!%p777_p2), %s177_s22, 128, %s179_s27, [#allocation7]  }
  0x31   : > { %187 = sbr.rel (%p797_p1) target bundleno = 113 (0x71), region = 28  ;;  %s189_s6 = sand.u32 (!%p797_p1), 1, %s666_s13  }
  0x32   : > { %s409_s7 = sshll.u32 (!%p797_p1), %s189_s6, 3  ;;  %s190_s8 = scalar_lea.sflag (!%p797_p1), [#allocation4], %s189_s6 }
  0x33   : > { %s815_s12 = scalar_lea.vmem (!%p797_p1), [#allocation3], %s409_s7 }
  0x36   : > { %636 = dma.done.wait (%p748_p6), %s190_s8, 128  }
  0x37   : > { %638 = vsyncadd (%p748_p6), %s190_s8, 4294967168  ;;  %s200_s18 = scalar_lea.sflag [#allocation7], %s189_s6  ;;  %s203_s20 = scalar_lea.vmem [#allocation6], %s409_s7 }
  0x38   : > { %640 = dma.done.wait (%p748_p6), %s200_s18, 128  }
  0x39   : > { %642 = vsyncadd (%p748_p6), %s200_s18, 4294967168  ;;  %s227_s4 = sand.u32 1, %s654_s10   ;;  %s412_s17 = sshll.u32 %s670_s14, 10  ;;  %v682_v0 = vmov 0.0  }
  0x3a   : > { %s829_s22 = sshll.u32 %s227_s4, 3  ;;  %240 = vst [vmem:[#allocation2] sm:$0xff] %v682_v0  ;;  %s243_s23 = sadd.s32 1024, %s412_s17 }
  0x3b   : > { %s229_s27 = scalar_lea.vmem [#allocation8], %s829_s22  ;;  %p413_p2 = scmp.gt.s32.totalorder %s243_s23, 512 }
  0x3d   : > { %247 = sbr.rel (%p413_p2) target bundleno = 74 (0x4a), region = 44 }
  0x42   : > { %v248_v1 = vld [vmem:[%s815_s12] sm:$0xff]  ;;  %v249_v2 = vld [vmem:[%s203_s20] sm:$0xff] }
  0x43   : > { %v250_v3 = vsub.f32 %v248_v1, %v249_v2  ;;  %v251_v4 = vld [vmem:[#allocation2] sm:$0xff] }
  0x45   : > { %v252_v5 = vmul.f32 %v250_v3, %v250_v3 }
  0x47   : > { %v254_v6 = vadd.f32 %v252_v5, %v251_v4 }
  0x49   : > { %255 = vst [vmem:[#allocation2] sm:$0xff] %v254_v6 }
  0x4a PF: > { %p414_p6 = scmp.le.s32.totalorder %s243_s23, 512 }
  0x4c   : > { %259 = sbr.rel (%p414_p6) target bundleno = 98 (0x62), region = 48 }
  0x51   : > { %v260_v7 = vlaneseq  ;;  %v265_v9 = vstv %s412_s17  ;;  %v269_v12 = vld [vmem:[%s815_s12] sm:$0xff]  ;;  %v270_v13 = vld [vmem:[%s203_s20] sm:$0xff] }
  0x52   : > { %v271_v15 = vsub.f32 %v269_v12, %v270_v13  ;;  %v273_v18 = vld [vmem:[#allocation2] sm:$0xff] }
  0x53   : > { %v261_v8 = vshrl.u32 %v260_v7, 7  ;;  %v263_v10 = vand.u32 127, %v260_v7 }
  0x55   : > { %v264_v11 = vmul.u32 128, %v261_v8 }
  0x57   : > { %v266_v14 = vadd.s32 %v265_v9, %v264_v11 }
  0x59   : > { %v267_v16 = vadd.s32 %v266_v14, %v263_v10 }
  0x5b   : > { %vm268_vm0 = vcmp.lt.s32.totalorder %v267_v16, 512 }
  0x5c   : > { %v272_v17 = vsel %vm268_vm0, %v271_v15, 0.0 }
  0x5d   : > { %v274_v19 = vmul.f32 %v272_v17, %v272_v17 }
  0x5f   : > { %v276_v20 = vadd.f32 %v274_v19, %v273_v18 }
  0x61   : > { %277 = vst [vmem:[#allocation2] sm:$0xff] %v276_v20 }
  0x62 PF: > { %s416_s21 = sshll.u32 %s670_s14, 3  ;;  %s296_s3 = sshll.u32 %s229_s27, 4  ;;  %s297_s3 = int_to_ptr.vmem [resolvable:$true] %s296_s3 }
  0x63   : > { %s294_s29 = scalar_lea.hbm %s884_s2, %s416_s21  ;;  %s284_s6 = scalar_lea.sflag [#allocation5], %s227_s4 }
  0x64   : > { %s298_s5 = sshll.u32 %s294_s29, 4  ;;  %s591_s18 = scalar_lea.hbm %s884_s2, 16  ;;  %s299_s5 = int_to_ptr.hbm [resolvable:$true] %s298_s5 }
  0x65   : > { %s585_s7 = sshra.s32 %s299_s5, 4  ;;  %s586_s7 = int_to_ptr.hbm [resolvable:$true] %s585_s7 }
  0x66   : > { %s587_s8 = scalar_lea.hbm %s586_s7, 8  ;;  %p592_p1 = scmp.lt.s32.totalorder %s586_s7, %s884_s2 }
  0x67   : > { %p588_p8 = scmp.ne.s32.totalorder %s586_s7, %s587_s8  ;;  %p593_p7 = scmp.lt.s32.totalorder %s591_s18, %s587_s8 }
  0x68   : > { %v281_v21 = vld [vmem:[#allocation2] sm:$0xff] }
  0x69   : > { %282 = vst [vmem:[%s229_s27] sm:$0xff] %v281_v21  ;;  %p589_p4 = pnand %p588_p8, %p762_p12  ;;  %p594_p9 = por %p593_p7, %p592_p1 }
  0x6b   : > { %p590_p11 = pneg %p589_p4 }
  0x6d   : > { %p595_p10 = pnand %p594_p9, %p590_p11 }
  0x6f   : > { %598 = shalt.err (!%p595_p10)
}
  0x70   : > { %423 = dma.vmem_to_hbm [thread:$0]  (%p762_p12), %s297_s3, 128, %s299_s5, %s284_s6  }
  0x71 PF: > { %s310_s4 = sand.u32 1, %s650_s9   ;;  %p433_p3 = pnand %p403_p13, %p767_p0 }
  0x72   : > { %s311_s22 = scalar_lea.sflag [#allocation5], %s310_s4 }
  0x73   : > { %p434_p5 = pneg %p433_p3 }
  0x75   : > { %644 = dma.done.wait (%p434_p5), %s311_s22, 128  }
  0x76   : > { %646 = vsyncadd (%p434_p5), %s311_s22, 4294967168  ;;  %s21_s16 = sadd.s32 1, %s678_s16   ;;  %s891_s9 = smov %s654_s10 }
  0x77   : > { %p18_p2 = scmp.ge.s32.totalorder %s21_s16, 4   ;;  %s892_s10 = smov %s658_s11 }
  0x78   : > { %s893_s11 = smov %s756_s24  ;;  %s894_s12 = smov %s666_s13 }
  0x79   : > { %s872_s13 = smov 0   ;;  %s895_s14 = smov %s674_s15 }
  0x7a   : > { %s896_s15 = smov %s898_s19  ;;  %20 = sbr.rel (!%p18_p2) target bundleno = 9 (0x9), region = 102 }
  0x7f   :  { %317 = vsyncpa [#allocation4], 1 }
  0x80   :  { %319 = vsyncpa [#allocation4 + $0x1], 1 }
  0x81   :  { %320 = vsyncpa [#allocation7], 1 }
  0x82   :  { %322 = vsyncpa [#allocation7 + $0x1], 1 }
  0x83   :  { %323 = vsyncpa [#allocation5], 1 }
  0x84   :  { %325 = vsyncpa [#allocation5 + $0x1], 1 }

</bundles_post_ra>
